<compile_context>
chip_gen: v5e
topology: v5e:2x2
jax: 0.10.0
libtpu: 0.0.40
codegen_flags: <defaults>
</compile_context>

<pallas_src>
import functools

import jax
import jax.numpy as jnp
from jax.experimental import pallas as pl
from jax.experimental.pallas import tpu as pltpu

VMEM_LIMIT = 48 * 1024 * 1024   # safe on v7x (64 MiB/TC); plenty for these block sizes
EDGE_NT_CAP = 512               # row tile cap for the edge-conv kernels
CONV5_NT_CAP = 1024             # row tile cap for conv5 + global pooling


def _leaky(v):
    # LeakyReLU(negative_slope=0.2); slope < 1 so max(x, 0.2*x) is exact.
    return jnp.maximum(v, 0.2 * v)


def _choose_tile(n, cap):
    """Largest row tile <= cap that divides n and is a multiple of 8 (else n).

    NOTE: if n has no multiple-of-8 divisor <= cap the kernel runs un-tiled (Nt=n);
    fine for typical DGCNN point counts (1024/2048) and the small test shapes here.
    """
    if n <= cap:
        return n
    start = cap - (cap % 8)
    for t in range(start, 7, -8):
        if n % t == 0:
            return t
    return n


# ----------------------------------------------------------------------------
# Pallas kernel 1: edge conv
#   result = LReLU( max_k(nbr_k @ W_nbr) + ctr @ (W_ctr - W_nbr) + b )
# (exact rewrite of conv([nbr-ctr | ctr]) + BN + LReLU + max over k: the activation is
#  monotone and the center term / bias are k-independent.)
# ----------------------------------------------------------------------------
def edge_conv_kernel(nbr_ref, ctr_ref, wn_ref, wd_ref, b_ref, o_ref):
    n_k = nbr_ref.shape[1]
    # Running max over neighbors of nbr_k @ W_nbr (bf16 MXU, f32 accumulation).
    m = jnp.dot(nbr_ref[0, 0], wn_ref[...], preferred_element_type=jnp.float32)
    for k in range(1, n_k):
        h = jnp.dot(nbr_ref[0, k], wn_ref[...], preferred_element_type=jnp.float32)
        m = jnp.maximum(m, h)
    # k-independent center term + folded-BN bias, applied once per tile.
    cterm = jnp.dot(ctr_ref[0], wd_ref[...], preferred_element_type=jnp.float32)
    z = m + cterm + b_ref[...]
    o_ref[0] = _leaky(z).astype(o_ref.dtype)


def edge_conv_pallas(nbr, ctr, wn, wd, b):
    """nbr: (B,K,N,C) bf16, ctr: (B,N,C) bf16, wn/wd: (C,Cout) bf16, b: (1,Cout) f32
    -> (B, N, Cout) bf16."""
    B, K, N, C = nbr.shape
    Cout = wn.shape[1]
    Nt = _choose_tile(N, EDGE_NT_CAP)
    return pl.pallas_call(
        edge_conv_kernel,
        out_shape=jax.ShapeDtypeStruct((B, N, Cout), jnp.bfloat16),
        grid=(B, N // Nt),
        in_specs=[
            pl.BlockSpec((1, K, Nt, C), lambda bb, nt: (bb, 0, nt, 0)),
            pl.BlockSpec((1, Nt, C), lambda bb, nt: (bb, nt, 0)),
            pl.BlockSpec((C, Cout), lambda bb, nt: (0, 0)),
            pl.BlockSpec((C, Cout), lambda bb, nt: (0, 0)),
            pl.BlockSpec((1, Cout), lambda bb, nt: (0, 0)),
        ],
        out_specs=pl.BlockSpec((1, Nt, Cout), lambda bb, nt: (bb, nt, 0)),
        compiler_params=pltpu.CompilerParams(
            dimension_semantics=("parallel", "parallel"),   # both axes megacore-splittable
            vmem_limit_bytes=VMEM_LIMIT,
        ),
    )(nbr, ctr, wn, wd, b)


def edge_conv_ref(nbr, ctr, w_full, b):
    """Original concat formulation in f32 (validates the weight-split algebra)."""
    nbr32 = nbr.astype(jnp.float32)                       # (B, K, N, C)
    ctr32 = ctr.astype(jnp.float32)[:, None]              # (B, 1, N, C)
    e = jnp.concatenate([nbr32 - ctr32, jnp.broadcast_to(ctr32, nbr32.shape)], axis=-1)
    h = jnp.einsum("bknc,cd->bknd", e, w_full)
    z = jnp.max(h, axis=1) + b
    return _leaky(z)


# ----------------------------------------------------------------------------
# Pallas kernel 2: conv5 (sum of partial matmuls over x1..x4) + LReLU + global max/avg
# ----------------------------------------------------------------------------
def conv5_pool_kernel(x1_ref, x2_ref, x3_ref, x4_ref,
                      w1_ref, w2_ref, w3_ref, w4_ref, b_ref,
                      o_ref, mx_ref, sm_ref, *, n_points):
    nt = pl.program_id(1)
    h = jnp.dot(x1_ref[0], w1_ref[...], preferred_element_type=jnp.float32)
    h = h + jnp.dot(x2_ref[0], w2_ref[...], preferred_element_type=jnp.float32)
    h = h + jnp.dot(x3_ref[0], w3_ref[...], preferred_element_type=jnp.float32)
    h = h + jnp.dot(x4_ref[0], w4_ref[...], preferred_element_type=jnp.float32)
    h = _leaky(h + b_ref[...])                       # (Nt, E) f32
    tmax = jnp.max(h, axis=0, keepdims=True)         # (1, E)
    tsum = jnp.sum(h, axis=0, keepdims=True)         # (1, E)

    @pl.when(nt == 0)
    def _():
        mx_ref[...] = tmax
        sm_ref[...] = tsum

    @pl.when(nt > 0)
    def _():
        mx_ref[...] = jnp.maximum(mx_ref[...], tmax)
        sm_ref[...] = sm_ref[...] + tsum

    @pl.when(nt == pl.num_programs(1) - 1)
    def _():
        e_dim = mx_ref.shape[-1]
        o_ref[0, :, 0:e_dim] = mx_ref[...]
        o_ref[0, :, e_dim:2 * e_dim] = sm_ref[...] * (1.0 / n_points)


def conv5_pool_pallas(xs, w_parts, b):
    """xs: 4x (B,N,Ci) bf16, w_parts: 4x (Ci,E) bf16, b: (1,E) f32 -> (B,2E) f32 [max|mean]."""
    B, N, _ = xs[0].shape
    E = w_parts[0].shape[1]
    Nt = _choose_tile(N, CONV5_NT_CAP)
    in_specs = []
    for x in xs:
        Ci = x.shape[-1]
        in_specs.append(pl.BlockSpec((1, Nt, Ci), lambda bb, nt: (bb, nt, 0)))
    for w in w_parts:
        Ci = w.shape[0]
        in_specs.append(pl.BlockSpec((Ci, E), lambda bb, nt: (0, 0)))
    in_specs.append(pl.BlockSpec((1, E), lambda bb, nt: (0, 0)))
    out = pl.pallas_call(
        functools.partial(conv5_pool_kernel, n_points=N),
        out_shape=jax.ShapeDtypeStruct((B, 1, 2 * E), jnp.float32),
        grid=(B, N // Nt),
        in_specs=in_specs,
        out_specs=pl.BlockSpec((1, 1, 2 * E), lambda bb, nt: (bb, 0, 0)),
        scratch_shapes=[pltpu.VMEM((1, E), jnp.float32),
                        pltpu.VMEM((1, E), jnp.float32)],
        compiler_params=pltpu.CompilerParams(
            dimension_semantics=("parallel", "arbitrary"),
            vmem_limit_bytes=VMEM_LIMIT,
        ),
    )(*xs, *w_parts, b)
    return out.reshape(B, 2 * E)


def conv5_pool_ref(xs, w_full, b):
    feats = jnp.concatenate([x.astype(jnp.float32) for x in xs], axis=-1)
    h = _leaky(jnp.einsum("bnc,cd->bnd", feats, w_full) + b)
    return jnp.concatenate([jnp.max(h, axis=1), jnp.mean(h, axis=1)], axis=-1)


# ----------------------------------------------------------------------------
# Pallas kernel 3: FC head (linear1+BN+LReLU -> linear2+BN+LReLU -> linear3),
# batched over all B rows in a single call.
# ----------------------------------------------------------------------------
def head_kernel(g_ref, w1_ref, b1_ref, w2_ref, b2_ref, w3_ref, b3_ref, o_ref):
    # TODO(synk): Dropout (dp1/dp2) is identity in inference mode; not applied here.
    g = g_ref[...].astype(jnp.bfloat16)
    h = jnp.dot(g, w1_ref[...], preferred_element_type=jnp.float32) + b1_ref[...]
    h = _leaky(h)
    h = jnp.dot(h.astype(jnp.bfloat16), w2_ref[...],
                preferred_element_type=jnp.float32) + b2_ref[...]
    h = _leaky(h)
    o_ref[...] = jnp.dot(h.astype(jnp.bfloat16), w3_ref[...],
                         preferred_element_type=jnp.float32) + b3_ref[...]


def head_pallas(g, w1, b1, w2, b2, w3, b3):
    B = g.shape[0]
    out_ch = w3.shape[1]
    return pl.pallas_call(
        head_kernel,
        out_shape=jax.ShapeDtypeStruct((B, out_ch), jnp.float32),
        compiler_params=pltpu.CompilerParams(vmem_limit_bytes=VMEM_LIMIT),
    )(g, w1, b1, w2, b2, w3, b3)


def head_ref(g, w1, b1, w2, b2, w3, b3):
    h = _leaky(jnp.dot(g.astype(jnp.bfloat16), w1,
                       preferred_element_type=jnp.float32) + b1)
    h = _leaky(jnp.dot(h.astype(jnp.bfloat16), w2,
                       preferred_element_type=jnp.float32) + b2)
    return jnp.dot(h.astype(jnp.bfloat16), w3,
                   preferred_element_type=jnp.float32) + b3


# ----------------------------------------------------------------------------
# JAX glue: knn + neighbor gather (data-dependent top-k / gather)
# ----------------------------------------------------------------------------
def knn_idx(feat, k):
    """feat: (B, N, C) bf16 -> indices of k nearest neighbors (B, N, k)."""
    # bf16 MXU pairwise inner products, f32 accumulation / norms.
    inner = jnp.einsum("bic,bjc->bij", feat, feat, preferred_element_type=jnp.float32)
    sq = jnp.sum(feat.astype(jnp.float32) ** 2, axis=-1)        # (B, N)
    neg_dist = 2.0 * inner - sq[:, :, None] - sq[:, None, :]    # -||xi - xj||^2
    return jax.lax.top_k(neg_dist, k)[1]


def gather_neighbors(feat, idx):
    """feat: (B, N, C) bf16, idx: (B, N, K) -> neighbor features (B, K, N, C) bf16.

    Only the tiny idx array is transposed; the gather writes the big tensor directly
    in (B, K, N, C) layout and in bf16 (no separate transpose/cast passes)."""
    idx_t = jnp.transpose(idx, (0, 2, 1))                       # (B, K, N)
    return jax.vmap(lambda f, i: f[i])(feat, idx_t)             # (B, K, N, C)


# ----------------------------------------------------------------------------
# Full forward
# ----------------------------------------------------------------------------
def dgcnn_forward(x, params, k, *, return_intermediates=False):
    """x: (B, 3, N) point cloud -> logits (B, output_channels)."""
    p = params
    inter = {}
    cur = jnp.transpose(x, (0, 2, 1)).astype(jnp.bfloat16)      # (B, N, 3) channels-last
    xs = []
    for i, layer in enumerate(p["edge"]):
        idx = knn_idx(cur, k)
        nbr = gather_neighbors(cur, idx)                        # (B, K, N, C) bf16
        nxt = edge_conv_pallas(nbr, cur, layer["wn"], layer["wd"], layer["b"])
        inter[f"nbr{i + 1}"] = nbr
        inter[f"ctr{i + 1}"] = cur
        inter[f"x{i + 1}"] = nxt
        cur = nxt                                               # (B, N, Cout) bf16
        xs.append(nxt)

    g = conv5_pool_pallas(xs, p["w5"], p["b5"])                 # (B, 2E) f32 [max|mean]
    inter["xs"], inter["g"] = xs, g

    logits = head_pallas(g, p["w6"], p["b6"], p["w7"], p["b7"], p["w8"], p["b8"])
    inter["logits"] = logits
    if return_intermediates:
        return logits, inter
    return logits


# ----------------------------------------------------------------------------
# Deterministic parameters; BatchNorm (inference) folded into the matmul weights.
# Edge-conv weights stored split per the [nbr-ctr | ctr] algebra; f32 originals kept
# only for validation.
# ----------------------------------------------------------------------------
def make_params(key, emb_dims=256, output_channels=40):
    eps = 1e-5
    keys = jax.random.split(key, 48)
    it = iter(keys)

    def dense(cin, cout, scale=0.1):
        return scale * jax.random.normal(next(it), (cin, cout), jnp.float32)

    def bn(c):
        gamma = 1.0 + 0.1 * jax.random.normal(next(it), (c,), jnp.float32)
        beta = 0.1 * jax.random.normal(next(it), (c,), jnp.float32)
        mean = 0.1 * jax.random.normal(next(it), (c,), jnp.float32)
        var = jax.random.uniform(next(it), (c,), jnp.float32, 0.5, 1.5)
        scale = gamma * jax.lax.rsqrt(var + eps)
        shift = beta - mean * scale
        return scale, shift

    def conv_bn(cin, cout):
        # bias-free conv + BN:  (x @ W) * s + t  ==  x @ (W * s) + t
        w = dense(cin, cout)
        s, t = bn(cout)
        return w * s[None, :], t[None, :]       # f32 folded weight / bias

    # edge convs (conv1..conv4); half-channel C, output Cout
    edge = []
    for chalf, cout in ((3, 64), (64, 64), (64, 128), (128, 256)):
        wf, b = conv_bn(2 * chalf, cout)        # original layout: rows [0:C]=nbr-ctr, [C:2C]=ctr
        wn = wf[:chalf]
        wd = wf[chalf:] - wf[:chalf]
        edge.append(dict(wf=wf,
                         wn=wn.astype(jnp.bfloat16),
                         wd=wd.astype(jnp.bfloat16),
                         b=b.astype(jnp.float32)))

    # conv5 + bn5, split into per-x chunks (64, 64, 128, 256)
    w5f, b5 = conv_bn(512, emb_dims)
    w5_parts = [w5f[0:64].astype(jnp.bfloat16), w5f[64:128].astype(jnp.bfloat16),
                w5f[128:256].astype(jnp.bfloat16), w5f[256:512].astype(jnp.bfloat16)]

    # linear1 (no bias) + bn6
    w6raw = dense(2 * emb_dims, 512)
    s6, t6 = bn(512)
    w6 = (w6raw * s6[None, :]).astype(jnp.bfloat16)
    b6 = t6[None, :].astype(jnp.float32)

    # linear2 (bias) + bn7:  bn(x@W + c) == x@(W*s) + (c*s + shift)
    w7raw = dense(512, 256)
    bias7 = 0.1 * jax.random.normal(next(it), (256,), jnp.float32)
    s7, t7 = bn(256)
    w7 = (w7raw * s7[None, :]).astype(jnp.bfloat16)
    b7 = (bias7 * s7 + t7)[None, :].astype(jnp.float32)

    # linear3 (plain)
    w8 = dense(256, output_channels).astype(jnp.bfloat16)
    b8 = (0.1 * jax.random.normal(next(it), (output_channels,), jnp.float32))[None, :]

    return dict(edge=edge, w5=w5_parts, w5f=w5f, b5=b5.astype(jnp.float32),
                w6=w6, b6=b6, w7=w7, b7=b7, w8=w8, b8=b8)


if __name__ == "__main__":
    key = jax.random.PRNGKey(0)
    kx, kp = jax.random.split(key)
    B, N, K_NBR = 2, 16, 8          # small test shapes
    EMB, NCLS = 256, 40             # emb_dims, output_channels
    x = jax.random.normal(kx, (B, 3, N), jnp.float32)
    params = make_params(kp, emb_dims=EMB, output_channels=NCLS)

    logits, inter = dgcnn_forward(x, params, K_NBR, return_intermediates=True)
    logits = jax.block_until_ready(logits)
    assert logits.shape == (B, NCLS)

    # Validation:
    #  * edge conv / conv5 are checked against the ORIGINAL concat-form math in f32
    #    (this also validates the [nbr-ctr | ctr] weight-split algebra).
    #  * head is checked against the identical bf16 math outside the kernel.
    for i in range(4):
        ref = edge_conv_ref(inter[f"nbr{i + 1}"], inter[f"ctr{i + 1}"],
                            params["edge"][i]["wf"], params["edge"][i]["b"])
        got = inter[f"x{i + 1}"].astype(jnp.float32)
        assert bool(jnp.allclose(got, ref, atol=3e-2, rtol=3e-2)), \
            f"edge_conv{i + 1} mismatch"

    g_ref = conv5_pool_ref(inter["xs"], params["w5f"], params["b5"])
    assert bool(jnp.allclose(inter["g"], g_ref, atol=3e-2, rtol=3e-2)), "conv5/pool mismatch"

    l_ref = head_ref(inter["g"], params["w6"], params["b6"], params["w7"],
                     params["b7"], params["w8"], params["b8"])
    assert bool(jnp.allclose(logits, l_ref, atol=2e-2, rtol=2e-2)), "head mismatch"

    print("KERNEL_OK")
</pallas_src>

<mosaic_0001>
module attributes {stable_mosaic.version = 11 : i64} {
  func.func @edge_conv_kernel(%arg0: i32, %arg1: i32, %arg2: memref<1x8x16x3xbf16, #tpu.memory_space<vmem>>, %arg3: memref<1x16x3xbf16, #tpu.memory_space<vmem>>, %arg4: memref<3x64xbf16, #tpu.memory_space<vmem>>, %arg5: memref<3x64xbf16, #tpu.memory_space<vmem>>, %arg6: memref<1x64xf32, #tpu.memory_space<vmem>>, %arg7: memref<1x16x64xbf16, #tpu.memory_space<vmem>>) attributes {dimension_semantics = [#tpu.dimension_semantics<parallel>, #tpu.dimension_semantics<parallel>], iteration_bounds = array<i64: 2, 1>, scalar_prefetch = 0 : i64, scratch_operands = 0 : i64, tpu.core_type = #tpu.core_type<tc>, window_params = [{transform_indices = @transform_0, window_bounds = array<i64: 1, 8, 16, 3>}, {transform_indices = @transform_1, window_bounds = array<i64: 1, 16, 3>}, {pipeline_mode = #tpu.pipeline_mode<synchronous>, transform_indices = @transform_2, window_bounds = array<i64: 3, 64>}, {pipeline_mode = #tpu.pipeline_mode<synchronous>, transform_indices = @transform_3, window_bounds = array<i64: 3, 64>}, {pipeline_mode = #tpu.pipeline_mode<synchronous>, transform_indices = @transform_4, window_bounds = array<i64: 1, 64>}, {transform_indices = @transform_5, window_bounds = array<i64: 1, 16, 64>}]} {
    %c0 = arith.constant 0 : index
    %c0_0 = arith.constant 0 : index
    %c0_1 = arith.constant 0 : index
    %c0_2 = arith.constant 0 : index
    %0 = vector.load %arg2[%c0, %c0_0, %c0_1, %c0_2] : memref<1x8x16x3xbf16, #tpu.memory_space<vmem>>, vector<1x1x16x3xbf16>
    %1 = vector.shape_cast %0 : vector<1x1x16x3xbf16> to vector<16x3xbf16>
    %c0_3 = arith.constant 0 : index
    %c0_4 = arith.constant 0 : index
    %2 = vector.load %arg4[%c0_3, %c0_4] : memref<3x64xbf16, #tpu.memory_space<vmem>>, vector<3x64xbf16>
    %cst = arith.constant dense<0.000000e+00> : vector<16x64xf32>
    %3 = tpu.matmul %1, %2, %cst {dimension_numbers = #tpu.dot_dimension_numbers<[1], [0], [0], [1], [0, 0, 1, 1], [], []>} : vector<16x3xbf16>, vector<3x64xbf16>, vector<16x64xf32> -> vector<16x64xf32>
    %c0_5 = arith.constant 0 : index
    %c1 = arith.constant 1 : index
    %c0_6 = arith.constant 0 : index
    %c0_7 = arith.constant 0 : index
    %4 = vector.load %arg2[%c0_5, %c1, %c0_6, %c0_7] : memref<1x8x16x3xbf16, #tpu.memory_space<vmem>>, vector<1x1x16x3xbf16>
    %5 = vector.shape_cast %4 : vector<1x1x16x3xbf16> to vector<16x3xbf16>
    %c0_8 = arith.constant 0 : index
    %c0_9 = arith.constant 0 : index
    %6 = vector.load %arg4[%c0_8, %c0_9] : memref<3x64xbf16, #tpu.memory_space<vmem>>, vector<3x64xbf16>
    %cst_10 = arith.constant dense<0.000000e+00> : vector<16x64xf32>
    %7 = tpu.matmul %5, %6, %cst_10 {dimension_numbers = #tpu.dot_dimension_numbers<[1], [0], [0], [1], [0, 0, 1, 1], [], []>} : vector<16x3xbf16>, vector<3x64xbf16>, vector<16x64xf32> -> vector<16x64xf32>
    %8 = arith.maximumf %3, %7 : vector<16x64xf32>
    %c0_11 = arith.constant 0 : index
    %c2 = arith.constant 2 : index
    %c0_12 = arith.constant 0 : index
    %c0_13 = arith.constant 0 : index
    %9 = vector.load %arg2[%c0_11, %c2, %c0_12, %c0_13] : memref<1x8x16x3xbf16, #tpu.memory_space<vmem>>, vector<1x1x16x3xbf16>
    %10 = vector.shape_cast %9 : vector<1x1x16x3xbf16> to vector<16x3xbf16>
    %c0_14 = arith.constant 0 : index
    %c0_15 = arith.constant 0 : index
    %11 = vector.load %arg4[%c0_14, %c0_15] : memref<3x64xbf16, #tpu.memory_space<vmem>>, vector<3x64xbf16>
    %cst_16 = arith.constant dense<0.000000e+00> : vector<16x64xf32>
    %12 = tpu.matmul %10, %11, %cst_16 {dimension_numbers = #tpu.dot_dimension_numbers<[1], [0], [0], [1], [0, 0, 1, 1], [], []>} : vector<16x3xbf16>, vector<3x64xbf16>, vector<16x64xf32> -> vector<16x64xf32>
    %13 = arith.maximumf %8, %12 : vector<16x64xf32>
    %c0_17 = arith.constant 0 : index
    %c3 = arith.constant 3 : index
    %c0_18 = arith.constant 0 : index
    %c0_19 = arith.constant 0 : index
    %14 = vector.load %arg2[%c0_17, %c3, %c0_18, %c0_19] : memref<1x8x16x3xbf16, #tpu.memory_space<vmem>>, vector<1x1x16x3xbf16>
    %15 = vector.shape_cast %14 : vector<1x1x16x3xbf16> to vector<16x3xbf16>
    %c0_20 = arith.constant 0 : index
    %c0_21 = arith.constant 0 : index
    %16 = vector.load %arg4[%c0_20, %c0_21] : memref<3x64xbf16, #tpu.memory_space<vmem>>, vector<3x64xbf16>
    %cst_22 = arith.constant dense<0.000000e+00> : vector<16x64xf32>
    %17 = tpu.matmul %15, %16, %cst_22 {dimension_numbers = #tpu.dot_dimension_numbers<[1], [0], [0], [1], [0, 0, 1, 1], [], []>} : vector<16x3xbf16>, vector<3x64xbf16>, vector<16x64xf32> -> vector<16x64xf32>
    %18 = arith.maximumf %13, %17 : vector<16x64xf32>
    %c0_23 = arith.constant 0 : index
    %c4 = arith.constant 4 : index
    %c0_24 = arith.constant 0 : index
    %c0_25 = arith.constant 0 : index
    %19 = vector.load %arg2[%c0_23, %c4, %c0_24, %c0_25] : memref<1x8x16x3xbf16, #tpu.memory_space<vmem>>, vector<1x1x16x3xbf16>
    %20 = vector.shape_cast %19 : vector<1x1x16x3xbf16> to vector<16x3xbf16>
    %c0_26 = arith.constant 0 : index
    %c0_27 = arith.constant 0 : index
    %21 = vector.load %arg4[%c0_26, %c0_27] : memref<3x64xbf16, #tpu.memory_space<vmem>>, vector<3x64xbf16>
    %cst_28 = arith.constant dense<0.000000e+00> : vector<16x64xf32>
    %22 = tpu.matmul %20, %21, %cst_28 {dimension_numbers = #tpu.dot_dimension_numbers<[1], [0], [0], [1], [0, 0, 1, 1], [], []>} : vector<16x3xbf16>, vector<3x64xbf16>, vector<16x64xf32> -> vector<16x64xf32>
    %23 = arith.maximumf %18, %22 : vector<16x64xf32>
    %c0_29 = arith.constant 0 : index
    %c5 = arith.constant 5 : index
    %c0_30 = arith.constant 0 : index
    %c0_31 = arith.constant 0 : index
    %24 = vector.load %arg2[%c0_29, %c5, %c0_30, %c0_31] : memref<1x8x16x3xbf16, #tpu.memory_space<vmem>>, vector<1x1x16x3xbf16>
    %25 = vector.shape_cast %24 : vector<1x1x16x3xbf16> to vector<16x3xbf16>
    %c0_32 = arith.constant 0 : index
    %c0_33 = arith.constant 0 : index
    %26 = vector.load %arg4[%c0_32, %c0_33] : memref<3x64xbf16, #tpu.memory_space<vmem>>, vector<3x64xbf16>
    %cst_34 = arith.constant dense<0.000000e+00> : vector<16x64xf32>
    %27 = tpu.matmul %25, %26, %cst_34 {dimension_numbers = #tpu.dot_dimension_numbers<[1], [0], [0], [1], [0, 0, 1, 1], [], []>} : vector<16x3xbf16>, vector<3x64xbf16>, vector<16x64xf32> -> vector<16x64xf32>
    %28 = arith.maximumf %23, %27 : vector<16x64xf32>
    %c0_35 = arith.constant 0 : index
    %c6 = arith.constant 6 : index
    %c0_36 = arith.constant 0 : index
    %c0_37 = arith.constant 0 : index
    %29 = vector.load %arg2[%c0_35, %c6, %c0_36, %c0_37] : memref<1x8x16x3xbf16, #tpu.memory_space<vmem>>, vector<1x1x16x3xbf16>
    %30 = vector.shape_cast %29 : vector<1x1x16x3xbf16> to vector<16x3xbf16>
    %c0_38 = arith.constant 0 : index
    %c0_39 = arith.constant 0 : index
    %31 = vector.load %arg4[%c0_38, %c0_39] : memref<3x64xbf16, #tpu.memory_space<vmem>>, vector<3x64xbf16>
    %cst_40 = arith.constant dense<0.000000e+00> : vector<16x64xf32>
    %32 = tpu.matmul %30, %31, %cst_40 {dimension_numbers = #tpu.dot_dimension_numbers<[1], [0], [0], [1], [0, 0, 1, 1], [], []>} : vector<16x3xbf16>, vector<3x64xbf16>, vector<16x64xf32> -> vector<16x64xf32>
    %33 = arith.maximumf %28, %32 : vector<16x64xf32>
    %c0_41 = arith.constant 0 : index
    %c7 = arith.constant 7 : index
    %c0_42 = arith.constant 0 : index
    %c0_43 = arith.constant 0 : index
    %34 = vector.load %arg2[%c0_41, %c7, %c0_42, %c0_43] : memref<1x8x16x3xbf16, #tpu.memory_space<vmem>>, vector<1x1x16x3xbf16>
    %35 = vector.shape_cast %34 : vector<1x1x16x3xbf16> to vector<16x3xbf16>
    %c0_44 = arith.constant 0 : index
    %c0_45 = arith.constant 0 : index
    %36 = vector.load %arg4[%c0_44, %c0_45] : memref<3x64xbf16, #tpu.memory_space<vmem>>, vector<3x64xbf16>
    %cst_46 = arith.constant dense<0.000000e+00> : vector<16x64xf32>
    %37 = tpu.matmul %35, %36, %cst_46 {dimension_numbers = #tpu.dot_dimension_numbers<[1], [0], [0], [1], [0, 0, 1, 1], [], []>} : vector<16x3xbf16>, vector<3x64xbf16>, vector<16x64xf32> -> vector<16x64xf32>
    %38 = arith.maximumf %33, %37 : vector<16x64xf32>
    %c0_47 = arith.constant 0 : index
    %c0_48 = arith.constant 0 : index
    %c0_49 = arith.constant 0 : index
    %39 = vector.load %arg3[%c0_47, %c0_48, %c0_49] : memref<1x16x3xbf16, #tpu.memory_space<vmem>>, vector<1x16x3xbf16>
    %40 = vector.shape_cast %39 : vector<1x16x3xbf16> to vector<16x3xbf16>
    %c0_50 = arith.constant 0 : index
    %c0_51 = arith.constant 0 : index
    %41 = vector.load %arg5[%c0_50, %c0_51] : memref<3x64xbf16, #tpu.memory_space<vmem>>, vector<3x64xbf16>
    %cst_52 = arith.constant dense<0.000000e+00> : vector<16x64xf32>
    %42 = tpu.matmul %40, %41, %cst_52 {dimension_numbers = #tpu.dot_dimension_numbers<[1], [0], [0], [1], [0, 0, 1, 1], [], []>} : vector<16x3xbf16>, vector<3x64xbf16>, vector<16x64xf32> -> vector<16x64xf32>
    %43 = arith.addf %38, %42 : vector<16x64xf32>
    %c0_53 = arith.constant 0 : index
    %c0_54 = arith.constant 0 : index
    %44 = vector.load %arg6[%c0_53, %c0_54] : memref<1x64xf32, #tpu.memory_space<vmem>>, vector<1x64xf32>
    %45 = vector.broadcast %44 : vector<1x64xf32> to vector<16x64xf32>
    %46 = arith.addf %43, %45 : vector<16x64xf32>
    %cst_55 = arith.constant 2.000000e-01 : f32
    %47 = vector.broadcast %cst_55 : f32 to vector<16x64xf32>
    %48 = arith.mulf %47, %46 : vector<16x64xf32>
    %49 = arith.maximumf %46, %48 : vector<16x64xf32>
    %50 = arith.truncf %49 : vector<16x64xf32> to vector<16x64xbf16>
    %c0_56 = arith.constant 0 : index
    %c0_57 = arith.constant 0 : index
    %c0_58 = arith.constant 0 : index
    %51 = vector.load %arg7[%c0_56, %c0_57, %c0_58] : memref<1x16x64xbf16, #tpu.memory_space<vmem>>, vector<1x16x64xbf16>
    %52 = vector.shape_cast %51 : vector<1x16x64xbf16> to vector<16x64xbf16>
    %53 = vector.shape_cast %50 : vector<16x64xbf16> to vector<1x16x64xbf16>
    tpu.vector_store %arg7[%c0_56, %c0_57, %c0_58], %53 {strides = array<i32>} : memref<1x16x64xbf16, #tpu.memory_space<vmem>>, vector<1x16x64xbf16>,
    return
  }
  func.func @transform_0(%arg0: i32, %arg1: i32) -> (i32, i32, i32, i32) {
    %c0_i32 = arith.constant 0 : i32
    %c0_i32_0 = arith.constant 0 : i32
    %c0_i32_1 = arith.constant 0 : i32
    return %arg0, %c0_i32, %arg1, %c0_i32_0 : i32, i32, i32, i32
  }
  func.func @transform_1(%arg0: i32, %arg1: i32) -> (i32, i32, i32) {
    %c0_i32 = arith.constant 0 : i32
    %c0_i32_0 = arith.constant 0 : i32
    return %arg0, %arg1, %c0_i32 : i32, i32, i32
  }
  func.func @transform_2(%arg0: i32, %arg1: i32) -> (i32, i32) {
    %c0_i32 = arith.constant 0 : i32
    %c0_i32_0 = arith.constant 0 : i32
    %c0_i32_1 = arith.constant 0 : i32
    return %c0_i32, %c0_i32_0 : i32, i32
  }
  func.func @transform_3(%arg0: i32, %arg1: i32) -> (i32, i32) {
    %c0_i32 = arith.constant 0 : i32
    %c0_i32_0 = arith.constant 0 : i32
    %c0_i32_1 = arith.constant 0 : i32
    return %c0_i32, %c0_i32_0 : i32, i32
  }
  func.func @transform_4(%arg0: i32, %arg1: i32) -> (i32, i32) {
    %c0_i32 = arith.constant 0 : i32
    %c0_i32_0 = arith.constant 0 : i32
    %c0_i32_1 = arith.constant 0 : i32
    return %c0_i32, %c0_i32_0 : i32, i32
  }
  func.func @transform_5(%arg0: i32, %arg1: i32) -> (i32, i32, i32) {
    %c0_i32 = arith.constant 0 : i32
    %c0_i32_0 = arith.constant 0 : i32
    return %arg0, %arg1, %c0_i32 : i32, i32, i32
  }
}

</mosaic_0001>

<bundles_post_ra>
// kernel: tpu_custom_call.1
= control target key start
LH: loop header
LB: loop body
LE: loop exit
PB: predicated region body
PF: predicated region fallthrough
CT: control target
= control target key end

     0   :  { %10 = vsyncpa [#allocation3], 0  ;;  %s1053_s0 = inlined_call_operand.vmem [shape: bf16[2,8,16,3], index: 0, kind: input, shape index: {}]   ;;  %s1054_s1 = inlined_call_operand.vmem [shape: bf16[2,16,3], index: 1, kind: input, shape index: {}]   ;;  %s1055_s2 = inlined_call_operand.vmem [shape: bf16[3,64], index: 2, kind: input, shape index: {}]   ;;  %s1056_s3 = inlined_call_operand.vmem [shape: bf16[3,64], index: 3, kind: input, shape index: {}]   ;;  %s1057_s4 = inlined_call_operand.vmem [shape: f32[1,64], index: 4, kind: input, shape index: {}]   ;;  %s1058_s5 = inlined_call_operand.hbm [shape: bf16[2,16,64], index: 5, kind: output, shape index: {}]  }
   0x1   :  { %12 = vsyncpa [#allocation3 + $0x1], 0  ;;  %s931_s18 = smov 0   ;;  %s933_s19 = smov 0  }
   0x2   :  { %s935_s20 = smov 0   ;;  %s937_s21 = smov 0  }
   0x3   :  { %s939_s22 = smov 0   ;;  %s941_s23 = smov 0  }
   0x4 LB: > { %s673_s24 = sadd.s32 4294967295, %s896_s23   ;;  %s674_s25 = sadd.s32 4294967294, %s896_s23   ;;  %s896_s23 = sphi %s941_s23, %s18_s23   ;;  %s892_s22 = sphi %s939_s22, %s1065_s22   ;;  %s888_s21 = sphi %s937_s21, %s1064_s21   ;;  %s884_s20 = sphi %s935_s20, %s1063_s20   ;;  %s880_s19 = sphi %s933_s19, %s1062_s19   ;;  %s876_s18 = sphi %s931_s18, %s1061_s18  }
   0x5   : > { %s30_s26 = sadd.s32 1, %s892_s22  ;;  %s158_s27 = sadd.s32 1, %s884_s20 }
   0x6   : > { %p32_p0 = scmp.ge.s32.totalorder %s30_s26, 2  ;;  %p168_p1 = scmp.ne.s32.totalorder %s884_s20, %s880_s19 }
   0x7   : > { %p169_p2 = scmp.eq.s32.totalorder %s673_s24, 1  ;;  %p174_p3 = scmp.ne.s32.totalorder %s880_s19, %s876_s18 }
   0x8   : > { %s1067_s26 = smov (%p32_p0, %s30_s26), 0  ;;  %p175_p5 = scmp.eq.s32.totalorder %s674_s25, 1 }
   0x9   : > { %p971_p4 = por %p169_p2, %p168_p1  ;;  %s153_s29 = ssub.s32 %s892_s22, %s1067_s26 }
   0xa   : > { %p677_p6 = scmp.ge.s32.totalorder %s896_s23, 1  ;;  %p156_p7 = scmp.eq.s32.totalorder %s153_s29, 0 }
   0xb   : > { %p978_p8 = por %p175_p5, %p174_p3  ;;  %p228_p9 = scmp.lt.s32.totalorder %s896_s23, 3 }
   0xc   : > { %s984_s6 = scalar_select %p156_p7, %s884_s20, %s158_s27  }
   0xd   : > { %p229_p10 = pnand %p677_p6, %p228_p9 }
   0xe   : > { %p270_p11 = scmp.lt.s32.totalorder (!%p229_p10), %s888_s21, 1  ;;  %s266_s7 = sand.u32 (!%p229_p10), 1, %s880_s19  }
   0xf   : > { %232 = sbr.rel (%p229_p10) target bundleno = 208 (0xd0), region = 40  ;;  %s678_s8 = sshll.u32 (!%p229_p10), %s266_s7, 3 }
  0x10   : > { %s268_s13 = scalar_lea.vmem (!%p229_p10), [#allocation2], %s678_s8  ;;  %s838_s27 = scalar_lea.hbm (!%p229_p10), %s1058_s5, 16 }
  0x11   : > { %s573_s14 = sshll.u32 (!%p229_p10), %s268_s13, 4  ;;  %s574_s14 = int_to_ptr.vmem [resolvable:$true] %s573_s14 }
  0x14   : > { %v293_v0 = vld [vmem:[%s1055_s2] sm:$0x3]  ;;  %vm303_vm0 = vcmask 1040384   ;;  %vm304_vm1 = vcmask 1041408   ;;  %v898_v1 = vmov 65535   ;;  %s991_s9 = scalar_select %p270_p11, %s888_s21, 1 }
  0x15   : > { %v305_v2 = vsel %vm303_vm0, 4294967295, %v898_v1  ;;  %v515_v5 = vld [vmem:[%s1056_s3] sm:$0x3]  ;;  %vm299_vm2 = vcmask 23552   ;;  %vm555_vm3 = vcmask 519168  }
  0x16   : > { %v306_v3 = vsel %vm304_vm1, %v305_v2, 0  ;;  %s747_s10 = sshll.u32 %s991_s9, 6  ;;  %s748_s16 = sshll.u32 %s991_s9, 3  ;;  %v817_v41 = vld [vmem:[%s1057_s4] ss:$0 sm:$0xff] }
  0x17   : > { %v308_v4 = vand.u32 %v306_v3, %v293_v0  ;;  %s277_s15 = scalar_lea.vmem %s1053_s0, %s747_s10  ;;  %v525_v10 = vand.u32 %v515_v5, %v306_v3  ;;  %s287_s25 = scalar_lea.vmem %s1054_s1, %s748_s16 }
  0x18   : > { %v749_v6 = vld [vmem:[%s277_s15] sm:$0xff]  ;;  %v750_v7 = vld [vmem:[%s277_s15 + $0x8] sm:$0xff]  ;;  %v751_v8 = vld [vmem:[%s277_s15 + $0x10] sm:$0xff]  ;;  %s758_s9 = sshll.u32 %s888_s21, 3  ;;  %s559_s21 = scalar_lea.sflag [#allocation3], %s266_s7 }
  0x19   : > { %317 = vmatpush.bf16.msra.mxu0 %v308_v4  ;;  %342 = vmatpush.bf16.msra.mxu1 %v308_v4  ;;  %v752_v9 = vld [vmem:[%s277_s15 + $0x18] sm:$0xff]  ;;  %v753_v11 = vld [vmem:[%s277_s15 + $0x20] sm:$0xff]  ;;  %v754_v12 = vld [vmem:[%s277_s15 + $0x28] sm:$0xff]  ;;  %s572_s12 = scalar_lea.hbm %s1058_s5, %s758_s9 }
  0x1a   : > { %369 = vmatpush.bf16.msra.mxu2 %v308_v4  ;;  %396 = vmatpush.bf16.msra.mxu3 %v308_v4  ;;  %v755_v13 = vld [vmem:[%s277_s15 + $0x30] sm:$0xff]  ;;  %v756_v14 = vld [vmem:[%s277_s15 + $0x38] sm:$0xff]  ;;  %v757_v15 = vld [vmem:[%s287_s25] sm:$0xff]  ;;  %s575_s15 = sshll.u32 %s572_s12, 4  ;;  %s576_s15 = int_to_ptr.hbm [resolvable:$true] %s575_s15 }
  0x1b   : > { %s832_s16 = sshra.s32 %s576_s15, 4  ;;  %s833_s16 = int_to_ptr.hbm [resolvable:$true] %s832_s16 }
  0x1c   : > { %687 = vmatmul.msk.bf16.vlgmr.msra.gmra.mxu0 %vm299_vm2, %v749_v6  ;;  %694 = vmatmul.msk.bf16.vlgmr.msra.gmra.mxu1 %vm299_vm2, %v750_v7  ;;  %s834_s17 = scalar_lea.hbm %s833_s16, 8  ;;  %p839_p1 = scmp.lt.s32.totalorder %s833_s16, %s1058_s5 }
  0x1d   : > { %423 = vmatpush.bf16.msrb.mxu0 %v308_v4  ;;  %701 = vmatmul.msk.bf16.vlgmr.msra.gmra.mxu2 %vm299_vm2, %v751_v8  ;;  %p835_p12 = scmp.ne.s32.totalorder %s833_s16, %s834_s17  ;;  %p840_p2 = scmp.lt.s32.totalorder %s838_s27, %s834_s17 }
  0x1e   : > { %477 = vmatpush.bf16.msrb.mxu2 %v308_v4  ;;  %708 = vmatmul.msk.bf16.vlgmr.msra.gmra.mxu3 %vm299_vm2, %v752_v9 }
  0x1f   : > { %504 = vmatpush.bf16.msrb.mxu3 %v308_v4  ;;  %450 = vmatpush.bf16.msrb.mxu1 %v308_v4  ;;  %p836_p13 = pnand %p835_p12, %p971_p4  ;;  %p841_p3 = por %p840_p2, %p839_p1 }
  0x21   : > { %534 = vmatpush.bf16.msra.mxu0 %v525_v10  ;;  %p837_p0 = pneg %p836_p13 }
  0x23   : > { %p842_p5 = pnand %p841_p3, %p837_p0 }
  0x2c   : > { %715 = vmatmul.msk.bf16.vlgmr.msrb.gmra.mxu0 %vm299_vm2, %v753_v11  ;;  %722 = vmatmul.msk.bf16.vlgmr.msrb.gmra.mxu1 %vm299_vm2, %v754_v12 }
  0x2d   : > { %729 = vmatmul.msk.bf16.vlgmr.msrb.gmra.mxu2 %vm299_vm2, %v755_v13 }
  0x2e   : > { %736 = vmatmul.msk.bf16.vlgmr.msrb.gmra.mxu3 %vm299_vm2, %v756_v14 }
  0x3c   : > { %741 = vmatmul.msk.bf16.vlgmr.msra.gmra.mxu0 %vm299_vm2, %v757_v15 }
  0x99   : > { %v319_v16 = vpop.f32.mrf.mxu0  ;;  %v344_v17 = vpop.f32.mrf.mxu1 }
  0x9a   : > { %v349_v22 = vmax.f32 %v319_v16, %v344_v17 }
  0xa0   : > { %v371_v18 = vpop.f32.mrf.mxu2 }
  0xa1   : > { %v398_v19 = vpop.f32.mrf.mxu3  ;;  %v321_v20 = vpop.f32.mrf.mxu0  ;;  %v376_v23 = vmax.f32 %v349_v22, %v371_v18 }
  0xa2   : > { %v346_v21 = vpop.f32.mrf.mxu1 }
  0xa3   : > { %v403_v27 = vmax.f32 %v376_v23, %v398_v19  ;;  %v350_v29 = vmax.f32 %v321_v20, %v346_v21 }
  0xa8   : > { %v373_v24 = vpop.f32.mrf.mxu2 }
  0xa9   : > { %v425_v25 = vpop.f32.mrf.mxu0  ;;  %v400_v26 = vpop.f32.mrf.mxu3  ;;  %v377_v31 = vmax.f32 %v350_v29, %v373_v24 }
  0xaa   : > { %v452_v28 = vpop.f32.mrf.mxu1  ;;  %v430_v30 = vmax.f32 %v403_v27, %v425_v25 }
  0xab   : > { %v404_v35 = vmax.f32 %v377_v31, %v400_v26 }
  0xac   : > { %v457_v34 = vmax.f32 %v430_v30, %v452_v28 }
  0xb0   : > { %v479_v32 = vpop.f32.mrf.mxu2 }
  0xb1   : > { %v427_v33 = vpop.f32.mrf.mxu0  ;;  %v484_v36 = vmax.f32 %v457_v34, %v479_v32  ;;  %v506_v37 = vpop.f32.mrf.mxu3 }
  0xb2   : > { %v431_v38 = vmax.f32 %v404_v35, %v427_v33  ;;  %v454_v39 = vpop.f32.mrf.mxu1 }
  0xb3   : > { %v511_v40 = vmax.f32 %v484_v36, %v506_v37 }
  0xb4   : > { %v458_v44 = vmax.f32 %v431_v38, %v454_v39 }
  0xb8   : > { %v481_v42 = vpop.f32.mrf.mxu2 }
  0xb9   : > { %v536_v43 = vpop.f32.mrf.mxu0  ;;  %v485_v46 = vmax.f32 %v458_v44, %v481_v42  ;;  %v508_v49 = vpop.f32.mrf.mxu3 }
  0xba   : > { %v541_v45 = vadd.f32 %v536_v43, %v511_v40 }
  0xbb   : > { %v512_v50 = vmax.f32 %v485_v46, %v508_v49 }
  0xbc   : > { %v547_v47 = vadd.f32 %v817_v41, %v541_v45 }
  0xbe   : > { %v549_v48 = vmul.f32 0.2, %v547_v47 }
  0xc0   : > { %v551_v51 = vmax.f32 %v547_v47, %v549_v48 }
  0xc1   : > { %v538_v52 = vpop.f32.mrf.mxu0 }
  0xc2   : > { %v553_v53 = vpack.c.bf16 %v551_v51, %v551_v51  ;;  %v542_v54 = vadd.f32 %v538_v52, %v512_v50 }
  0xc4   : > { %556 = vst.msk [vmem:[%s268_s13] sm:$0xf] %vm555_vm3, %v553_v53  ;;  %v548_v55 = vadd.f32 %v817_v41, %v542_v54 }
  0xc6   : > { %v550_v56 = vmul.f32 0.2, %v548_v55 }
  0xc8   : > { %v552_v57 = vmax.f32 %v548_v55, %v550_v56 }
  0xca   : > { %v554_v58 = vpack.c.bf16 %v552_v57, %v552_v57 }
  0xcc   : > { %557 = vst.msk [vmem:[%s268_s13 + $0x4] sm:$0xf] %vm555_vm3, %v554_v58 }
  0xcd   : > { %845 = shalt.err (!%p842_p5)
}
  0xce   : > { %s899_s7 = smov 64   ;;  %s900_s9 = smov 4  }
  0xcf   : > { %759 = dma.vmem_to_hbm [thread:$0]  (%p971_p4), %s574_s14, 128, %s576_s15, %s559_s21, %s899_s7, %s899_s7, %s900_s9  }
  0xd0 PF: > { %p765_p6 = scmp.ge.s32.totalorder %s896_s23, 2  ;;  %s590_s10 = sand.u32 1, %s876_s18  }
  0xd1   : > { %s591_s11 = scalar_lea.sflag [#allocation3], %s590_s10 }
  0xd2   : > { %p762_p7 = pnand %p765_p6, %p978_p8 }
  0xd4   : > { %p763_p9 = pneg %p762_p7 }
  0xd6   : > { %871 = dma.done.wait (%p763_p9), %s591_s11, 128  }
  0xd7   : > { %873 = vsyncadd (%p763_p9), %s591_s11, 4294967168  ;;  %s18_s23 = sadd.s32 1, %s896_s23   ;;  %s1061_s18 = smov %s880_s19 }
  0xd8   : > { %p15_p10 = scmp.ge.s32.totalorder %s18_s23, 4   ;;  %s1062_s19 = smov %s884_s20 }
  0xd9   : > { %s1063_s20 = smov %s984_s6  ;;  %s1064_s21 = smov %s892_s22 }
  0xda   : > { %s1065_s22 = smov %s1067_s26  ;;  %17 = sbr.rel (!%p15_p10) target bundleno = 4 (0x4), region = 85 }
  0xdf   :  { %597 = vsyncpa [#allocation3], 1 }
  0xe0   :  { %599 = vsyncpa [#allocation3 + $0x1], 1 }

</bundles_post_ra>
